<compile_context>
chip_gen: v6e
topology: v6e:2x2x1
jax: 0.10.0
libtpu: 0.0.40
codegen_flags: <defaults>
</compile_context>

<pallas_src>
import jax
import jax.numpy as jnp
import numpy as np
from jax.experimental import pallas as pl
from jax.experimental.pallas import tpu as pltpu

BN_EPS = 1e-5
LANE = 128


def _round_up(x, m):
    return ((x + m - 1) // m) * m


def _cdiv(a, b):
    return -(-a // b)


def _make_mlp_kernel(hidden_sizes, bias_offsets, head_bias_off):
    """Fused MLP kernel for `len(hidden_sizes)` hidden blocks (BN pre-folded).

    Activations are kept batch-on-lanes: every tensor in the body is (rows, TB).
    """
    num_hidden = len(hidden_sizes)

    def kernel(x_ref, *refs):
        # refs layout: w_0 .. w_{L-1} (bf16, [out, in]), w_head8 (bf16, [8, H_last]),
        #              aux (f32, [total, 1] packed biases), out_ref (f32, [1, TB])
        w_refs = refs[:num_hidden]
        w_head_ref = refs[num_hidden]
        aux_ref = refs[num_hidden + 1]
        out_ref = refs[num_hidden + 2]

        h = x_ref[...]                                   # (F, TB) bf16, batch on lanes
        for j, hs in enumerate(hidden_sizes):
            w = w_refs[j][...]                           # (hs, in) bf16, BN folded in
            b = aux_ref[bias_offsets[j]:bias_offsets[j] + hs, :]       # (hs, 1) f32
            acc = jnp.dot(w, h, preferred_element_type=jnp.float32) + b
            # ReLU in f32; Dropout(0.3) is identity in eval mode.
            h = jnp.maximum(acc, 0.0).astype(jnp.bfloat16)             # (hs, TB) bf16

        # Head: (8, H_last) @ (H_last, TB) -> (8, TB); rows 1..7 of w_head8 are zero
        # padding (kept for sublane alignment).  Batch stays on the lane axis.
        z8 = jnp.dot(w_head_ref[...], h, preferred_element_type=jnp.float32)
        z = z8[0:1, :] + aux_ref[head_bias_off:head_bias_off + 1, :]   # (1, TB) f32

        # Exact sigmoid (kernel is HBM-bound, the divide is free).
        out_ref[...] = 1.0 / (1.0 + jnp.exp(-z))

    return kernel


def init_params(key, input_features, hidden_sizes):
    """Deterministic parameter init matching the shapes in __init__."""
    params = []
    in_size = input_features
    for h_size in hidden_sizes:
        key, kw, kb, kg, kbe = jax.random.split(key, 5)
        scale = 1.0 / np.sqrt(in_size)
        w = jax.random.uniform(kw, (h_size, in_size), jnp.float32, -scale, scale)
        b = jax.random.uniform(kb, (h_size,), jnp.float32, -scale, scale)
        gamma = 1.0 + 0.1 * jax.random.normal(kg, (h_size,), jnp.float32)
        beta = 0.1 * jax.random.normal(kbe, (h_size,), jnp.float32)
        running_mean = jnp.zeros((h_size,), jnp.float32)   # PyTorch init
        running_var = jnp.ones((h_size,), jnp.float32)     # PyTorch init
        params.append(dict(w=w, b=b, gamma=gamma, beta=beta,
                           mean=running_mean, var=running_var))
        in_size = h_size
    key, kw, kb = jax.random.split(key, 3)
    scale = 1.0 / np.sqrt(in_size)
    w_out = jax.random.uniform(kw, (1, in_size), jnp.float32, -scale, scale)
    b_out = jax.random.uniform(kb, (1,), jnp.float32, -scale, scale)
    return params, (w_out, b_out)


def _fold_params(params, out_params):
    """Fold each eval-mode BatchNorm affine into the following Linear.

    Returns weights in [out, in] form (for W @ h with batch on lanes).
    """
    ws, bs = [], []
    s_prev = t_prev = None
    for p in params:
        W, b = p["w"], p["b"]                      # [out, in], [out]
        if s_prev is None:
            W_eff, b_eff = W, b
        else:
            W_eff = W * s_prev[None, :]            # scale input columns
            b_eff = W @ t_prev + b
        ws.append(W_eff)                           # keep [out, in]
        bs.append(b_eff)
        s_prev = p["gamma"] * jax.lax.rsqrt(p["var"] + BN_EPS)
        t_prev = p["beta"] - p["mean"] * s_prev
    w_out, b_out = out_params                      # [1, in_last], [1]
    if s_prev is None:
        w_head, b_head = w_out, b_out
    else:
        w_head = w_out * s_prev[None, :]           # [1, H_last]
        b_head = w_out @ t_prev + b_out            # [1]
    return ws, bs, w_head, b_head


def depression_predictor_forward(x, params, out_params, *, tile_rows=16384):
    """Eval-mode forward of DepressionPredictor as one fused Pallas kernel."""
    B, F = x.shape
    hidden_sizes = tuple(int(p["w"].shape[0]) for p in params)
    ws, bs, w_head, b_head = _fold_params(params, out_params)
    H_last = int(ws[-1].shape[0]) if ws else F

    # ---- adaptive batch tile on the LANE axis ---------------------------------
    # TB must be a multiple of 128 (it is the last dim of the x / out blocks).
    # Prefer >= 2 grid steps so both v7x TensorCores get work, and size TB from B
    # so an unlucky batch size does not pad up to a whole extra tile.
    cap = max(_round_up(int(tile_rows), LANE), LANE)
    G = max(_cdiv(B, cap), 1)
    if B > LANE and G < 2:
        G = 2                                  # v7x megacore: keep both cores busy
    TB = _round_up(_cdiv(B, G), LANE)
    G = _cdiv(B, TB)
    B_pad = G * TB

    # ---- single fused wrapper pass over x: transpose -> bf16 -> zero-pad ------
    # Batch lands on the lane axis; zero-padded columns keep exp/sigmoid finite
    # in lanes that are sliced away afterwards.
    x_fb = jnp.pad(x.astype(jnp.bfloat16).T, ((0, 0), (0, B_pad - B)))   # (F, B_pad)

    ws_bf16 = [w.astype(jnp.bfloat16) for w in ws]             # bf16 MXU operands
    w_head8 = jnp.zeros((8, H_last), jnp.bfloat16).at[0, :].set(
        jnp.reshape(w_head, (-1,)).astype(jnp.bfloat16))

    # Pack folded biases + head bias into one (total, 1) f32 column; segments are
    # 8-aligned so the in-kernel sublane slices stay aligned for any hidden size.
    offs, off = [], 0
    for hsz in hidden_sizes:
        offs.append(off)
        off += _round_up(hsz, 8)
    head_off = off
    total = off + 8
    aux = jnp.zeros((total, 1), jnp.float32)
    for o, b in zip(offs, bs):
        aux = aux.at[o:o + b.shape[0], 0].set(b)
    aux = aux.at[head_off, 0].set(jnp.reshape(b_head, ()))

    kernel = _make_mlp_kernel(hidden_sizes, tuple(offs), head_off)

    in_specs = [pl.BlockSpec((F, TB), lambda i: (0, i))]       # x streamed, lane-dense
    for w in ws_bf16:                                          # params resident in VMEM
        in_specs.append(pl.BlockSpec(w.shape, lambda i: (0, 0)))
    in_specs.append(pl.BlockSpec(w_head8.shape, lambda i: (0, 0)))
    in_specs.append(pl.BlockSpec(aux.shape, lambda i: (0, 0)))

    # Advisory cost estimate: mem-bound custom call, ~2*B*sum(in*out) flops.
    dims, prev = [], F
    for hsz in hidden_sizes:
        dims.append((prev, hsz))
        prev = hsz
    dims.append((prev, 1))
    flops = 2 * B_pad * sum(a * b for a, b in dims)
    bytes_accessed = (x_fb.size * 2 + B_pad * 4
                      + sum(w.size * 2 for w in ws_bf16)
                      + w_head8.size * 2 + aux.size * 4)
    cost = pl.CostEstimate(flops=flops, transcendentals=B_pad,
                           bytes_accessed=bytes_accessed)

    out = pl.pallas_call(
        kernel,
        out_shape=jax.ShapeDtypeStruct((1, B_pad), jnp.float32),
        grid_spec=pltpu.PrefetchScalarGridSpec(
            num_scalar_prefetch=0,
            grid=(G,),
            in_specs=in_specs,
            out_specs=pl.BlockSpec((1, TB), lambda i: (0, i)),  # lane-dense wide stores
        ),
        compiler_params=pltpu.CompilerParams(
            dimension_semantics=("parallel",),        # megacore on v7x
            vmem_limit_bytes=48 * 1024 * 1024,        # headroom; < 64 MiB v7x physical
        ),
        cost_estimate=cost,
    )(x_fb, *ws_bf16, w_head8, aux)

    # (1, B_pad) lane-dense row -> (B, 1) column (layout plumbing in the wrapper).
    return out.reshape(B_pad)[:B].reshape(B, 1)


def reference_forward(x, params, out_params):
    """Pure-JAX f32 reference matching the PyTorch module in eval mode."""
    h = x
    for p in params:
        h = h @ p["w"].T + p["b"]
        h = jnp.maximum(h, 0.0)
        h = p["gamma"] * (h - p["mean"]) * jax.lax.rsqrt(p["var"] + BN_EPS) + p["beta"]
    w_out, b_out = out_params
    z = h @ w_out.T + b_out
    return jax.nn.sigmoid(z)


if __name__ == "__main__":
    input_features = 16
    hidden_sizes = [32, 16]
    batch = 8

    key = jax.random.PRNGKey(0)
    key, kx, kp = jax.random.split(key, 3)
    x = jax.random.normal(kx, (batch, input_features), jnp.float32)
    params, out_params = init_params(kp, input_features, hidden_sizes)

    out = depression_predictor_forward(x, params, out_params)
    out = jax.block_until_ready(out)

    ref = reference_forward(x, params, out_params)
    assert out.shape == (batch, 1)
    # bf16 matmul operands -> relaxed tolerance vs the f32 reference.
    np.testing.assert_allclose(np.asarray(out), np.asarray(ref), rtol=2e-2, atol=2e-2)

    print("KERNEL_OK")
</pallas_src>

<mosaic_0001>
module attributes {stable_mosaic.version = 11 : i64} {
  func.func @kernel(%arg0: i32, %arg1: memref<16x128xbf16, #tpu.memory_space<vmem>>, %arg2: memref<32x16xbf16, #tpu.memory_space<vmem>>, %arg3: memref<16x32xbf16, #tpu.memory_space<vmem>>, %arg4: memref<8x16xbf16, #tpu.memory_space<vmem>>, %arg5: memref<56x1xf32, #tpu.memory_space<vmem>>, %arg6: memref<1x128xf32, #tpu.memory_space<vmem>>) attributes {dimension_semantics = [#tpu.dimension_semantics<parallel>], iteration_bounds = array<i64: 1>, scalar_prefetch = 0 : i64, scratch_operands = 0 : i64, tpu.core_type = #tpu.core_type<tc>, window_params = [{transform_indices = @transform_0, window_bounds = array<i64: 16, 128>}, {pipeline_mode = #tpu.pipeline_mode<synchronous>, transform_indices = @transform_1, window_bounds = array<i64: 32, 16>}, {pipeline_mode = #tpu.pipeline_mode<synchronous>, transform_indices = @transform_2, window_bounds = array<i64: 16, 32>}, {pipeline_mode = #tpu.pipeline_mode<synchronous>, transform_indices = @transform_3, window_bounds = array<i64: 8, 16>}, {pipeline_mode = #tpu.pipeline_mode<synchronous>, transform_indices = @transform_4, window_bounds = array<i64: 56, 1>}, {transform_indices = @transform_5, window_bounds = array<i64: 1, 128>}]} {
    %c0 = arith.constant 0 : index
    %c0_0 = arith.constant 0 : index
    %0 = vector.load %arg1[%c0, %c0_0] : memref<16x128xbf16, #tpu.memory_space<vmem>>, vector<16x128xbf16>
    %c0_1 = arith.constant 0 : index
    %c0_2 = arith.constant 0 : index
    %1 = vector.load %arg2[%c0_1, %c0_2] : memref<32x16xbf16, #tpu.memory_space<vmem>>, vector<32x16xbf16>
    %c0_3 = arith.constant 0 : index
    %c0_4 = arith.constant 0 : index
    %2 = vector.load %arg5[%c0_3, %c0_4] : memref<56x1xf32, #tpu.memory_space<vmem>>, vector<32x1xf32>
    %cst = arith.constant dense<0.000000e+00> : vector<32x128xf32>
    %3 = tpu.matmul %1, %0, %cst {dimension_numbers = #tpu.dot_dimension_numbers<[1], [0], [0], [1], [0, 0, 1, 1], [], []>} : vector<32x16xbf16>, vector<16x128xbf16>, vector<32x128xf32> -> vector<32x128xf32>
    %4 = vector.broadcast %2 : vector<32x1xf32> to vector<32x128xf32>
    %5 = arith.addf %3, %4 : vector<32x128xf32>
    %cst_5 = arith.constant 0.000000e+00 : f32
    %6 = vector.broadcast %cst_5 : f32 to vector<32x128xf32>
    %7 = arith.maximumf %5, %6 : vector<32x128xf32>
    %8 = arith.truncf %7 : vector<32x128xf32> to vector<32x128xbf16>
    %c0_6 = arith.constant 0 : index
    %c0_7 = arith.constant 0 : index
    %9 = vector.load %arg3[%c0_6, %c0_7] : memref<16x32xbf16, #tpu.memory_space<vmem>>, vector<16x32xbf16>
    %c32 = arith.constant 32 : index
    %c0_8 = arith.constant 0 : index
    %10 = vector.load %arg5[%c32, %c0_8] : memref<56x1xf32, #tpu.memory_space<vmem>>, vector<16x1xf32>
    %cst_9 = arith.constant dense<0.000000e+00> : vector<16x128xf32>
    %11 = tpu.matmul %9, %8, %cst_9 {dimension_numbers = #tpu.dot_dimension_numbers<[1], [0], [0], [1], [0, 0, 1, 1], [], []>} : vector<16x32xbf16>, vector<32x128xbf16>, vector<16x128xf32> -> vector<16x128xf32>
    %12 = vector.broadcast %10 : vector<16x1xf32> to vector<16x128xf32>
    %13 = arith.addf %11, %12 : vector<16x128xf32>
    %cst_10 = arith.constant 0.000000e+00 : f32
    %14 = vector.broadcast %cst_10 : f32 to vector<16x128xf32>
    %15 = arith.maximumf %13, %14 : vector<16x128xf32>
    %16 = arith.truncf %15 : vector<16x128xf32> to vector<16x128xbf16>
    %c0_11 = arith.constant 0 : index
    %c0_12 = arith.constant 0 : index
    %17 = vector.load %arg4[%c0_11, %c0_12] : memref<8x16xbf16, #tpu.memory_space<vmem>>, vector<8x16xbf16>
    %cst_13 = arith.constant dense<0.000000e+00> : vector<8x128xf32>
    %18 = tpu.matmul %17, %16, %cst_13 {dimension_numbers = #tpu.dot_dimension_numbers<[1], [0], [0], [1], [0, 0, 1, 1], [], []>} : vector<8x16xbf16>, vector<16x128xbf16>, vector<8x128xf32> -> vector<8x128xf32>
    %19 = vector.extract_strided_slice %18 {offsets = [0, 0], sizes = [1, 128], strides = [1, 1]} : vector<8x128xf32> to vector<1x128xf32>
    %c48 = arith.constant 48 : index
    %c0_14 = arith.constant 0 : index
    %20 = vector.load %arg5[%c48, %c0_14] : memref<56x1xf32, #tpu.memory_space<vmem>>, vector<1x1xf32>
    %21 = vector.broadcast %20 : vector<1x1xf32> to vector<1x128xf32>
    %22 = arith.addf %19, %21 : vector<1x128xf32>
    %cst_15 = arith.constant 0.000000e+00 : f32
    %23 = vector.broadcast %cst_15 : f32 to vector<1x128xf32>
    %24 = arith.subf %23, %22 : vector<1x128xf32>
    %25 = math.exp %24 : vector<1x128xf32>
    %cst_16 = arith.constant 1.000000e+00 : f32
    %26 = vector.broadcast %cst_16 : f32 to vector<1x128xf32>
    %27 = arith.addf %26, %25 : vector<1x128xf32>
    %cst_17 = arith.constant 1.000000e+00 : f32
    %28 = vector.broadcast %cst_17 : f32 to vector<1x128xf32>
    %29 = arith.divf %28, %27 : vector<1x128xf32>
    %c0_18 = arith.constant 0 : index
    %c0_19 = arith.constant 0 : index
    %30 = vector.load %arg6[%c0_18, %c0_19] : memref<1x128xf32, #tpu.memory_space<vmem>>, vector<1x128xf32>
    tpu.vector_store %arg6[%c0_18, %c0_19], %29 {strides = array<i32>} : memref<1x128xf32, #tpu.memory_space<vmem>>, vector<1x128xf32>,
    return
  }
  func.func @transform_0(%arg0: i32) -> (i32, i32) {
    %c0_i32 = arith.constant 0 : i32
    %c0_i32_0 = arith.constant 0 : i32
    return %c0_i32, %arg0 : i32, i32
  }
  func.func @transform_1(%arg0: i32) -> (i32, i32) {
    %c0_i32 = arith.constant 0 : i32
    %c0_i32_0 = arith.constant 0 : i32
    %c0_i32_1 = arith.constant 0 : i32
    return %c0_i32, %c0_i32_0 : i32, i32
  }
  func.func @transform_2(%arg0: i32) -> (i32, i32) {
    %c0_i32 = arith.constant 0 : i32
    %c0_i32_0 = arith.constant 0 : i32
    %c0_i32_1 = arith.constant 0 : i32
    return %c0_i32, %c0_i32_0 : i32, i32
  }
  func.func @transform_3(%arg0: i32) -> (i32, i32) {
    %c0_i32 = arith.constant 0 : i32
    %c0_i32_0 = arith.constant 0 : i32
    %c0_i32_1 = arith.constant 0 : i32
    return %c0_i32, %c0_i32_0 : i32, i32
  }
  func.func @transform_4(%arg0: i32) -> (i32, i32) {
    %c0_i32 = arith.constant 0 : i32
    %c0_i32_0 = arith.constant 0 : i32
    %c0_i32_1 = arith.constant 0 : i32
    return %c0_i32, %c0_i32_0 : i32, i32
  }
  func.func @transform_5(%arg0: i32) -> (i32, i32) {
    %c0_i32 = arith.constant 0 : i32
    %c0_i32_0 = arith.constant 0 : i32
    return %c0_i32, %arg0 : i32, i32
  }
}

</mosaic_0001>

<bundles_post_ra>
// kernel: tpu_custom_call.1
= control target key start
LH: loop header
LB: loop body
LE: loop exit
PB: predicated region body
PF: predicated region fallthrough
CT: control target
= control target key end

     0   :  { %vm68_vm0 = vcmask 130048   ;;  %v341_v3 = vmov 0   ;;  %s417_s0 = inlined_call_operand.vmem [shape: bf16[16,128], index: 0, kind: input, shape index: {}]   ;;  %s418_s1 = inlined_call_operand.vmem [shape: bf16[32,16], index: 1, kind: input, shape index: {}]   ;;  %s419_s2 = inlined_call_operand.vmem [shape: bf16[16,32], index: 2, kind: input, shape index: {}]   ;;  %s420_s3 = inlined_call_operand.vmem [shape: bf16[8,16], index: 3, kind: input, shape index: {}]   ;;  %s421_s4 = inlined_call_operand.vmem [shape: f32[56,1], index: 4, kind: input, shape index: {}]   ;;  %s422_s5 = inlined_call_operand.hbm [shape: f32[1,128], index: 5, kind: output, shape index: {}]  }
   0x1   :  { %v311_v0 = vld [vmem:[%s417_s0] sm:$0xff]   ;;  %v313_v2 = vld [vmem:[%s418_s1 + $0x8] sm:$0xff]   ;;  %309 = vset.pattern.permute.xlu0 %v341_v3  ;;  %v30_v4 = vld [vmem:[%s421_s4 + $0x10] sm:$0xff]  ;;  %310 = vset.pattern.permute.xlu1 %v341_v3 }
   0x2   :  { %v312_v1 = vld [vmem:[%s418_s1] sm:$0xff]   ;;  %285 = vmatprep.subr.bf16.mxu0 %v311_v0  ;;  %44 = vperm.xlu0 %309, %v30_v4   ;;  %v31_v6 = vld [vmem:[%s421_s4 + $0x18] sm:$0xff]  ;;  %v29_v7 = vld [vmem:[%s421_s4 + $0x8] sm:$0xff] }
   0x3   :  { %286 = vmatpush3.bf16.msra.mxu0 %v311_v0  ;;  %287 = vmatprep.mubr.msk.bf16.mxu0 %vm68_vm0, %v312_v1  ;;  %v28_v5 = vld [vmem:[%s421_s4] sm:$0xff] }
   0x4   :  { %34 = vperm.xlu1 %310, %v28_v5  }
   0x6   :  { %288 = vmatmul.mubr.msk.bf16.vlgmr.msra.gmra.mxu0 %vm68_vm0, %v313_v2 }
   0x7   :  { %10 = vsyncpa [#allocation3], 0  ;;  %49 = vperm.xlu0 %309, %v31_v6   ;;  %v132_v8 = vld [vmem:[%s421_s4 + $0x20] sm:$0xff]  ;;  %v133_v9 = vld [vmem:[%s421_s4 + $0x28] sm:$0xff]  ;;  %v342_v11 = vmov 0.0   ;;  %vm343_vm1 = vmmov 0  }
   0x8   :  { %39 = vperm.xlu1 %310, %v29_v7   ;;  %v241_v10 = vld [vmem:[%s421_s4 + $0x30] sm:$0x1]  ;;  %291 = vmatprep.subr.bf16.mxu1 %v342_v11  ;;  %v314_v30 = vld [vmem:[%s419_s2] sm:$0xff]   ;;  %vm149_vm2 = vcmask 261120   ;;  %s344_s2 = smov [#allocation2]  }
   0x9   :  { %299 = vmatprep.subr.bf16.mxu0 %v342_v11  ;;  %295 = vmatprep.mubr.msk.bf16.mxu1 %vm343_vm1, %v342_v11  ;;  %v197_v42 = vld [vmem:[%s420_s3] sm:$0xf]  ;;  %s261_s14 = sshll.u32 %s344_s2, 4  ;;  %s262_s14 = int_to_ptr.vmem [resolvable:$true] %s261_s14 }
   0xa   :  { %301 = vmatprep.mubr.msk.bf16.mxu0 %vm343_vm1, %v342_v11  ;;  %s319_s3 = scalar_lea.vmem %s262_s14, 16  ;;  %s323_s15 = scalar_lea.vmem %s262_s14, 32 }
   0xb   :  { %136 = vperm.xlu0 %309, %v132_v8   ;;  %p320_p0 = scmp.ne.s32.totalorder %s262_s14, %s319_s3  ;;  %p324_p1 = scmp.lt.s32.totalorder %s262_s14, %s262_s14 }
   0xc   :  { %141 = vperm.xlu1 %310, %v133_v9   ;;  %p325_p2 = scmp.lt.s32.totalorder %s323_s15, %s319_s3 }
   0xe   :  { %p326_p3 = por %p325_p2, %p324_p1 }
   0xf   :  { %244 = vperm.xlu0 %309, %v241_v10  }
  0x10   :  { %p327_p4 = pnand %p326_p3, %p320_p0 }
  0x7d   :  { %v45_v12 = vpop.permute.xlu0 %44 }
  0x7f   :  { %v35_v13 = vpop.permute.xlu1 %34 }
  0x82   :  { %v50_v17 = vpop.permute.xlu0 %49 }
  0x83   :  { %v40_v20 = vpop.permute.xlu1 %39 }
  0x86   :  { %v137_v32 = vpop.permute.xlu0 %136 }
  0x87   :  { %v142_v35 = vpop.permute.xlu1 %141 }
  0x8a   :  { %v245_v43 = vpop.permute.xlu0 %244 }
  0xc6   :  { %v289_v14 = vpop.f32.mrf.mxu0 }
  0xc7   :  { %v118_v16 = vadd.f32 %v289_v14, %v45_v12 }
  0xc8   :  { %v109_v15 = vpop.f32.mrf.mxu0 }
  0xc9   :  { %v126_v22 = vmax.f32 %v118_v16, 0.0  ;;  %v110_v23 = vadd.f32 %v109_v15, %v35_v13 }
  0xca   :  { %v290_v18 = vpop.f32.mrf.mxu0 }
  0xcb   :  { %v121_v19 = vadd.f32 %v290_v18, %v50_v17  ;;  %v124_v28 = vmax.f32 %v110_v23, 0.0 }
  0xcc   :  { %v112_v21 = vpop.f32.mrf.mxu0 }
  0xcd   :  { %v127_v24 = vmax.f32 %v121_v19, 0.0  ;;  %v113_v25 = vadd.f32 %v112_v21, %v40_v20 }
  0xcf   :  { %v125_v26 = vmax.f32 %v113_v25, 0.0  ;;  %v129_v27 = vpack.c.bf16 %v127_v24, %v126_v22 }
  0xd1   :  { %292 = vmatpush3.bf16.msra.mxu1 %v129_v27  ;;  %v128_v29 = vpack.c.bf16 %v125_v26, %v124_v28 }
  0xd2   :  { %293 = vmatprep.subr.bf16.mxu1 %v342_v11 }
  0xd5   :  { %294 = vmatpush3.bf16.msra.mxu1 %v128_v29 }
  0xd8   :  { %296 = vmatmul.mubr.msk.bf16.vlgmr.msra.gmra.mxu1 %vm149_vm2, %v314_v30 }
 0x198   :  { %v187_v31 = vpop.f32.mrf.mxu1 }
 0x199   :  { %v188_v34 = vadd.f32 %v187_v31, %v137_v32 }
 0x19a   :  { %v297_v33 = vpop.f32.mrf.mxu1 }
 0x19b   :  { %v194_v39 = vmax.f32 %v188_v34, 0.0 }
 0x19c   :  { %v190_v36 = vpop.f32.mrf.mxu1 }
 0x19d   :  { %v191_v37 = vadd.f32 %v190_v36, %v142_v35 }
 0x19e   :  { %v298_v38 = vpop.f32.mrf.mxu1 }
 0x19f   :  { %v195_v40 = vmax.f32 %v191_v37, 0.0 }
 0x1a1   :  { %v196_v41 = vpack.c.bf16 %v195_v40, %v194_v39 }
 0x1a3   :  { %300 = vmatpush3.bf16.msra.mxu0 %v196_v41 }
 0x1a6   :  { %302 = vmatmul.mubr.msk.bf16.vlgmr.msra.gmra.mxu0 %vm68_vm0, %v197_v42 }
 0x266   :  { %v235_v44 = vpop.f32.mrf.mxu0 }
 0x267   :  { %v247_v45 = vadd.f32 %v245_v43, %v235_v44 }
 0x268   :  { %v303_v46 = vpop.f32.mrf.mxu0 }
 0x269   :  { %v248_v47 = vsub.f32 0.0, %v247_v45 }
 0x26a   :  { %v238_v48 = vpop.f32.mrf.mxu0 }
 0x26b   :  { %v249_v49 = vmul.f32 1.442695, %v248_v47 }
 0x26c   :  { %v304_v50 = vpop.f32.mrf.mxu0 }
 0x26d   :  { %315 = vpow2.f32 %v249_v49 }
 0x27a   :  { %v316_v51 = vpop.eup %315 }
 0x27b   :  { %v251_v52 = vadd.f32 1.0, %v316_v51 }
 0x27d   :  { %317 = vrcp.f32 %v251_v52 }
 0x28a   :  { %v318_v53 = vpop.eup %317 }
 0x28b   :  { %254 = vst [vmem:[#allocation2] sm:$0x1] %v318_v53 }
 0x28c   :  { %330 = shalt.err (!%p327_p4)
}
 0x28d   :  { %264 = dma.vmem_to_hbm [thread:$0]  %s262_s14, 16, %s422_s5, [#allocation3]  }
 0x28e   :  { %339 = dma.done.wait [#allocation3], 16  }
 0x28f   :  { %340 = vsyncadd [#allocation3], 4294967280 }
 0x290   :  { %268 = vsyncpa [#allocation3], 1 }

</bundles_post_ra>
